<compile_context>
chip_gen: v6e
topology: v6e:2x2x1
jax: 0.10.0
libtpu: 0.0.40
codegen_flags: <defaults>
</compile_context>

<pallas_src>
import math
import jax
import jax.numpy as jnp
from jax.experimental import pallas as pl
from jax.experimental.pallas import tpu as pltpu

EMBED_DIM = 32
NUM_HEADS = 4
HEAD_DIM = EMBED_DIM // NUM_HEADS
FFN_DIM = 4 * EMBED_DIM
SEQ_LEN = 8
BATCH = 2
N_ROWS = SEQ_LEN * BATCH
LN_EPS = 1e-5

# Column layout of the packed (E, 256) weight buffer: [ w1 | wqkv | wo ]
_W1_OFF = 0
_WQKV_OFF = FFN_DIM                       # 128
_WO_OFF = FFN_DIM + 3 * EMBED_DIM         # 224
_WPACK_COLS = FFN_DIM + 4 * EMBED_DIM     # 256


def _layer_norm(x, g, b):
    mu = jnp.mean(x, axis=-1, keepdims=True)
    xc = x - mu
    var = jnp.mean(xc * xc, axis=-1, keepdims=True)
    return xc * jax.lax.rsqrt(var + LN_EPS) * g + b


def encoder_layer_kernel(x_ref, wpack_ref, w2_ref, misc_ref, o_ref):
    E, F, H, Dh, N, B = EMBED_DIM, FFN_DIM, NUM_HEADS, HEAD_DIM, N_ROWS, BATCH

    x = x_ref[...]                          # (N, E): rows seq-major, batch-minor
    misc = misc_ref[...]                    # (8, F): packed biases + LN params

    bqkv = misc[0:1, 0:3 * E]               # (1, 3E); q-part pre-scaled on host
    bo = misc[1:2, 0:E]
    b1 = misc[2:3, 0:F]
    b2 = misc[3:4, 0:E]
    ln0g, ln0b = misc[4:5, 0:E], misc[5:6, 0:E]
    ln1g, ln1b = misc[6:7, 0:E], misc[7:8, 0:E]

    # Static column views into the packed weight buffer (free address math).
    w1 = wpack_ref[:, _W1_OFF:_W1_OFF + F]              # (E, F)
    wqkv = wpack_ref[:, _WQKV_OFF:_WQKV_OFF + 3 * E]    # (E, 3E)
    wo = wpack_ref[:, _WO_OFF:_WO_OFF + E]              # (E, E)

    # ---- pre-LN self-attention ----
    xn = _layer_norm(x, ln0g, ln0b)
    qkv = jnp.dot(xn, wqkv, preferred_element_type=jnp.float32) + bqkv   # (N, 3E)

    # Heads -> leading batch dim: one 2-D transpose + aligned (sublane/8) reshape.
    qkv_t = qkv.T.reshape(3 * H, Dh, N)     # (3H, Dh, N) = (12, 8, 16)
    q_t = qkv_t[0:H]                        # (H, Dh, N)
    k_t = qkv_t[H:2 * H]                    # (H, Dh, N)
    v_t = qkv_t[2 * H:3 * H]                # (H, Dh, N)
    qh = jnp.swapaxes(q_t, 1, 2)            # (H, N, Dh)

    # Batched scores over all N rows; same-batch mask is additive and finite
    # (exp underflows to exactly 0; no -inf / NaN hazard).
    scores = jnp.einsum('hqd,hdk->hqk', qh, k_t,
                        preferred_element_type=jnp.float32)              # (H, N, N)
    row = jax.lax.broadcasted_iota(jnp.int32, (N, N), 0)
    col = jax.lax.broadcasted_iota(jnp.int32, (N, N), 1)
    scores = scores + jnp.where((row % B) == (col % B), 0.0, -1e9)

    scores = scores - jnp.max(scores, axis=-1, keepdims=True)
    e = jnp.exp(scores)
    p = e / jnp.sum(e, axis=-1, keepdims=True)          # exact divide (review)

    # Context in transposed layout, then merge heads with an aligned reshape + .T
    ctx_t = jnp.einsum('hdk,hqk->hdq', v_t, p,
                       preferred_element_type=jnp.float32)               # (H, Dh, N)
    attn = ctx_t.reshape(E, N).T                                          # (N, E)

    attn = jnp.dot(attn, wo, preferred_element_type=jnp.float32) + bo
    x = x + attn                             # residual (res_dropout identity in eval)

    # ---- pre-LN feed-forward ----
    yn = _layer_norm(x, ln1g, ln1b)
    h1 = jnp.dot(yn, w1, preferred_element_type=jnp.float32) + b1
    h1 = jnp.maximum(h1, 0.0)                # ReLU (relu_dropout identity in eval)
    h2 = jnp.dot(h1, w2_ref[...], preferred_element_type=jnp.float32) + b2
    o_ref[...] = (x + h2).astype(o_ref.dtype)


def pack_params(p):
    """One-time host-side prep: fuse QKV (scale folded into Q), column-pack the
    three 32-row weight matrices, and pack biases/LN params into one buffer."""
    E, F = EMBED_DIM, FFN_DIM
    scale = 1.0 / math.sqrt(HEAD_DIM)
    wqkv = jnp.concatenate([p["wq"] * scale, p["wk"], p["wv"]], axis=1)   # (E, 3E)
    bqkv = jnp.concatenate([p["bq"] * scale, p["bk"], p["bv"]], axis=1)   # (1, 3E)
    wpack = jnp.concatenate([p["w1"], wqkv, p["wo"]], axis=1)             # (E, 256)
    misc = jnp.zeros((8, F), jnp.float32)
    misc = misc.at[0, 0:3 * E].set(bqkv[0])
    misc = misc.at[1, 0:E].set(p["bo"][0])
    misc = misc.at[2, 0:F].set(p["b1"][0])
    misc = misc.at[3, 0:E].set(p["b2"][0])
    misc = misc.at[4, 0:E].set(p["ln0_g"][0])
    misc = misc.at[5, 0:E].set(p["ln0_b"][0])
    misc = misc.at[6, 0:E].set(p["ln1_g"][0])
    misc = misc.at[7, 0:E].set(p["ln1_b"][0])
    return wpack, p["w2"], misc


@jax.jit
def transformer_encoder_layer(x_sbe, wpack, w2, misc):
    """x_sbe: (seq, batch, embed) float32.  Returns the same shape."""
    S, B, E = x_sbe.shape
    x2 = x_sbe.reshape(S * B, E)            # free row-major flatten (no transpose)
    vmem = pl.BlockSpec(memory_space=pltpu.MemorySpace.VMEM)
    out = pl.pallas_call(
        encoder_layer_kernel,
        out_shape=jax.ShapeDtypeStruct((S * B, E), jnp.float32),
        in_specs=[vmem, vmem, vmem, vmem],
        out_specs=vmem,
    )(x2, wpack, w2, misc)
    return out.reshape(S, B, E)


def _xavier_uniform(key, out_f, in_f):
    bound = math.sqrt(6.0 / (in_f + out_f))
    # PyTorch layout (out_f, in_f); stored pre-transposed (in_f, out_f)
    w = jax.random.uniform(key, (out_f, in_f), jnp.float32, -bound, bound)
    return w.T


def init_params(key):
    keys = jax.random.split(key, 7)
    E, F = EMBED_DIM, FFN_DIM
    return {
        # attention projections (pre-transposed so kernel does x @ W)
        "wq": _xavier_uniform(keys[0], E, E), "bq": jnp.zeros((1, E), jnp.float32),
        "wk": _xavier_uniform(keys[1], E, E), "bk": jnp.zeros((1, E), jnp.float32),
        "wv": _xavier_uniform(keys[2], E, E), "bv": jnp.zeros((1, E), jnp.float32),
        "wo": _xavier_uniform(keys[3], E, E), "bo": jnp.zeros((1, E), jnp.float32),
        # FFN
        "w1": _xavier_uniform(keys[4], F, E), "b1": jnp.zeros((1, F), jnp.float32),
        "w2": _xavier_uniform(keys[5], E, F), "b2": jnp.zeros((1, E), jnp.float32),
        # LayerNorms
        "ln0_g": jnp.ones((1, E), jnp.float32), "ln0_b": jnp.zeros((1, E), jnp.float32),
        "ln1_g": jnp.ones((1, E), jnp.float32), "ln1_b": jnp.zeros((1, E), jnp.float32),
    }


def reference_forward(x_sbe, p):
    """Pure-JAX reference mirroring the PyTorch forward (eval mode)."""
    def ln(x, g, b):
        mu = jnp.mean(x, -1, keepdims=True)
        xc = x - mu
        var = jnp.mean(xc * xc, -1, keepdims=True)
        return xc * jax.lax.rsqrt(var + LN_EPS) * g + b

    S, B, E = x_sbe.shape
    residual = x_sbe
    xn = ln(x_sbe, p["ln0_g"], p["ln0_b"])
    scaling = 1.0 / math.sqrt(HEAD_DIM)
    q = (xn @ p["wq"] + p["bq"]) * scaling
    k = xn @ p["wk"] + p["bk"]
    v = xn @ p["wv"] + p["bv"]
    qh = q.reshape(S, B, NUM_HEADS, HEAD_DIM).transpose(1, 2, 0, 3)
    kh = k.reshape(S, B, NUM_HEADS, HEAD_DIM).transpose(1, 2, 0, 3)
    vh = v.reshape(S, B, NUM_HEADS, HEAD_DIM).transpose(1, 2, 0, 3)
    scores = jnp.einsum("bhqd,bhkd->bhqk", qh, kh)
    probs = jax.nn.softmax(scores, axis=-1)
    attn = jnp.einsum("bhqk,bhkd->bhqd", probs, vh)
    attn = attn.transpose(2, 0, 1, 3).reshape(S, B, E)
    attn = attn @ p["wo"] + p["bo"]
    x = residual + attn
    residual = x
    yn = ln(x, p["ln1_g"], p["ln1_b"])
    h = jax.nn.relu(yn @ p["w1"] + p["b1"])
    h = h @ p["w2"] + p["b2"]
    return residual + h


if __name__ == "__main__":
    key = jax.random.PRNGKey(0)
    k_x, k_p = jax.random.split(key)
    x = jax.random.normal(k_x, (SEQ_LEN, BATCH, EMBED_DIM), jnp.float32)
    params = init_params(k_p)

    wpack, w2, misc = pack_params(params)   # one-time host-side packing
    out = transformer_encoder_layer(x, wpack, w2, misc)
    out = jax.block_until_ready(out)

    with jax.default_matmul_precision("highest"):
        ref = reference_forward(x, params)

    assert out.shape == (SEQ_LEN, BATCH, EMBED_DIM)
    assert jnp.allclose(out, ref, atol=5e-3, rtol=5e-3), "mismatch vs reference"

    print("KERNEL_OK")
</pallas_src>

<mosaic_0001>
module attributes {stable_mosaic.version = 11 : i64} {
  func.func @encoder_layer_kernel(%arg0: memref<16x32xf32, #tpu.memory_space<vmem>>, %arg1: memref<32x256xf32, #tpu.memory_space<vmem>>, %arg2: memref<128x32xf32, #tpu.memory_space<vmem>>, %arg3: memref<8x128xf32, #tpu.memory_space<vmem>>, %arg4: memref<16x32xf32, #tpu.memory_space<vmem>>) attributes {dimension_semantics = [], scalar_prefetch = 0 : i64, scratch_operands = 0 : i64, tpu.core_type = #tpu.core_type<tc>} {
    %c0 = arith.constant 0 : index
    %c0_0 = arith.constant 0 : index
    %0 = vector.load %arg0[%c0, %c0_0] : memref<16x32xf32, #tpu.memory_space<vmem>>, vector<16x32xf32>
    %c0_1 = arith.constant 0 : index
    %c0_2 = arith.constant 0 : index
    %1 = vector.load %arg3[%c0_1, %c0_2] : memref<8x128xf32, #tpu.memory_space<vmem>>, vector<8x128xf32>
    %2 = vector.extract_strided_slice %1 {offsets = [0, 0], sizes = [1, 96], strides = [1, 1]} : vector<8x128xf32> to vector<1x96xf32>
    %3 = vector.extract_strided_slice %1 {offsets = [1, 0], sizes = [1, 32], strides = [1, 1]} : vector<8x128xf32> to vector<1x32xf32>
    %4 = vector.extract_strided_slice %1 {offsets = [2, 0], sizes = [1, 128], strides = [1, 1]} : vector<8x128xf32> to vector<1x128xf32>
    %5 = vector.extract_strided_slice %1 {offsets = [3, 0], sizes = [1, 32], strides = [1, 1]} : vector<8x128xf32> to vector<1x32xf32>
    %6 = vector.extract_strided_slice %1 {offsets = [4, 0], sizes = [1, 32], strides = [1, 1]} : vector<8x128xf32> to vector<1x32xf32>
    %7 = vector.extract_strided_slice %1 {offsets = [5, 0], sizes = [1, 32], strides = [1, 1]} : vector<8x128xf32> to vector<1x32xf32>
    %8 = vector.extract_strided_slice %1 {offsets = [6, 0], sizes = [1, 32], strides = [1, 1]} : vector<8x128xf32> to vector<1x32xf32>
    %9 = vector.extract_strided_slice %1 {offsets = [7, 0], sizes = [1, 32], strides = [1, 1]} : vector<8x128xf32> to vector<1x32xf32>
    %c0_3 = arith.constant 0 : index
    %c0_4 = arith.constant 0 : index
    %10 = vector.load %arg1[%c0_3, %c0_4] : memref<32x256xf32, #tpu.memory_space<vmem>>, vector<32x128xf32>
    %c0_5 = arith.constant 0 : index
    %c128 = arith.constant 128 : index
    %11 = vector.load %arg1[%c0_5, %c128] : memref<32x256xf32, #tpu.memory_space<vmem>>, vector<32x96xf32>
    %c0_6 = arith.constant 0 : index
    %c224 = arith.constant 224 : index
    %12 = vector.load %arg1[%c0_6, %c224] : memref<32x256xf32, #tpu.memory_space<vmem>>, vector<32x32xf32>
    %cst = arith.constant dense<0.000000e+00> : vector<16xf32>
    %13 = vector.multi_reduction <add>, %0, %cst [1] : vector<16x32xf32> to vector<16xf32>
    %14 = vector.shape_cast %13 : vector<16xf32> to vector<16x1xf32>
    %cst_7 = arith.constant 3.200000e+01 : f32
    %15 = vector.broadcast %cst_7 : f32 to vector<16x1xf32>
    %16 = arith.divf %14, %15 : vector<16x1xf32>
    %17 = vector.broadcast %16 : vector<16x1xf32> to vector<16x32xf32>
    %18 = arith.subf %0, %17 : vector<16x32xf32>
    %19 = arith.mulf %18, %18 : vector<16x32xf32>
    %cst_8 = arith.constant dense<0.000000e+00> : vector<16xf32>
    %20 = vector.multi_reduction <add>, %19, %cst_8 [1] : vector<16x32xf32> to vector<16xf32>
    %21 = vector.shape_cast %20 : vector<16xf32> to vector<16x1xf32>
    %cst_9 = arith.constant 3.200000e+01 : f32
    %22 = vector.broadcast %cst_9 : f32 to vector<16x1xf32>
    %23 = arith.divf %21, %22 : vector<16x1xf32>
    %cst_10 = arith.constant 9.99999974E-6 : f32
    %24 = vector.broadcast %cst_10 : f32 to vector<16x1xf32>
    %25 = arith.addf %23, %24 : vector<16x1xf32>
    %26 = math.rsqrt %25 : vector<16x1xf32>
    %27 = vector.broadcast %26 : vector<16x1xf32> to vector<16x32xf32>
    %28 = arith.mulf %18, %27 : vector<16x32xf32>
    %29 = vector.broadcast %6 : vector<1x32xf32> to vector<16x32xf32>
    %30 = arith.mulf %28, %29 : vector<16x32xf32>
    %31 = vector.broadcast %7 : vector<1x32xf32> to vector<16x32xf32>
    %32 = arith.addf %30, %31 : vector<16x32xf32>
    %cst_11 = arith.constant dense<0.000000e+00> : vector<16x96xf32>
    %33 = tpu.matmul %32, %11, %cst_11 {dimension_numbers = #tpu.dot_dimension_numbers<[1], [0], [0], [1], [0, 0, 1, 1], [], []>} : vector<16x32xf32>, vector<32x96xf32>, vector<16x96xf32> -> vector<16x96xf32>
    %34 = vector.broadcast %2 : vector<1x96xf32> to vector<16x96xf32>
    %35 = arith.addf %33, %34 : vector<16x96xf32>
    %36 = tpu.transpose %35, [1, 0] : vector<16x96xf32> -> vector<96x16xf32>
    %37 = vector.shape_cast %36 : vector<96x16xf32> to vector<12x8x16xf32>
    %38 = vector.extract_strided_slice %37 {offsets = [0, 0, 0], sizes = [4, 8, 16], strides = [1, 1, 1]} : vector<12x8x16xf32> to vector<4x8x16xf32>
    %39 = vector.extract_strided_slice %37 {offsets = [4, 0, 0], sizes = [4, 8, 16], strides = [1, 1, 1]} : vector<12x8x16xf32> to vector<4x8x16xf32>
    %40 = vector.extract_strided_slice %37 {offsets = [8, 0, 0], sizes = [4, 8, 16], strides = [1, 1, 1]} : vector<12x8x16xf32> to vector<4x8x16xf32>
    %41 = tpu.transpose %38, [0, 2, 1] : vector<4x8x16xf32> -> vector<4x16x8xf32>
    "tpu.trace_start"() <{level = 10 : i32, message = "hqd,hdk->hqk"}> : () -> ()
    %cst_12 = arith.constant dense<0.000000e+00> : vector<4x16x16xf32>
    %42 = tpu.matmul %41, %39, %cst_12 {dimension_numbers = #tpu.dot_dimension_numbers<[2], [1], [1], [2], [0, 0, 0, 1, 1, 2], [0], [0]>} : vector<4x16x8xf32>, vector<4x8x16xf32>, vector<4x16x16xf32> -> vector<4x16x16xf32>
    "tpu.trace_stop"() : () -> ()
    %43 = tpu.iota {dimensions = array<i32: 0>} : vector<16x16xi32>
    %44 = tpu.iota {dimensions = array<i32: 1>} : vector<16x16xi32>
    %c2_i32 = arith.constant 2 : i32
    %c0_i32 = arith.constant 0 : i32
    %45 = arith.cmpi eq, %c2_i32, %c0_i32 : i32
    %c1_i32 = arith.constant 1 : i32
    %46 = arith.select %45, %c1_i32, %c2_i32 : i32
    %47 = vector.broadcast %46 : i32 to vector<16x16xi32>
    %48 = arith.remsi %43, %47 : vector<16x16xi32>
    %c0_i32_13 = arith.constant 0 : i32
    %49 = vector.broadcast %c0_i32_13 : i32 to vector<16x16xi32>
    %50 = arith.cmpi ne, %48, %49 : vector<16x16xi32>
    %c0_i32_14 = arith.constant 0 : i32
    %51 = vector.broadcast %c0_i32_14 : i32 to vector<16x16xi32>
    %52 = arith.cmpi slt, %48, %51 : vector<16x16xi32>
    %c0_i32_15 = arith.constant 0 : i32
    %53 = arith.cmpi slt, %46, %c0_i32_15 : i32
    %54 = vector.broadcast %53 : i1 to vector<16x16xi1>
    %55 = vector.broadcast %54 : vector<16x16xi1> to vector<16x16xi1>
    %56 = arith.xori %52, %55 : vector<16x16xi1>
    %57 = arith.andi %56, %50 : vector<16x16xi1>
    %58 = vector.broadcast %46 : i32 to vector<16x16xi32>
    %59 = arith.addi %48, %58 : vector<16x16xi32>
    %60 = arith.select %57, %59, %48 : vector<16x16xi1>, vector<16x16xi32>
    %c2_i32_16 = arith.constant 2 : i32
    %c0_i32_17 = arith.constant 0 : i32
    %61 = arith.cmpi eq, %c2_i32_16, %c0_i32_17 : i32
    %c1_i32_18 = arith.constant 1 : i32
    %62 = arith.select %61, %c1_i32_18, %c2_i32_16 : i32
    %63 = vector.broadcast %62 : i32 to vector<16x16xi32>
    %64 = arith.remsi %44, %63 : vector<16x16xi32>
    %c0_i32_19 = arith.constant 0 : i32
    %65 = vector.broadcast %c0_i32_19 : i32 to vector<16x16xi32>
    %66 = arith.cmpi ne, %64, %65 : vector<16x16xi32>
    %c0_i32_20 = arith.constant 0 : i32
    %67 = vector.broadcast %c0_i32_20 : i32 to vector<16x16xi32>
    %68 = arith.cmpi slt, %64, %67 : vector<16x16xi32>
    %c0_i32_21 = arith.constant 0 : i32
    %69 = arith.cmpi slt, %62, %c0_i32_21 : i32
    %70 = vector.broadcast %69 : i1 to vector<16x16xi1>
    %71 = vector.broadcast %70 : vector<16x16xi1> to vector<16x16xi1>
    %72 = arith.xori %68, %71 : vector<16x16xi1>
    %73 = arith.andi %72, %66 : vector<16x16xi1>
    %74 = vector.broadcast %62 : i32 to vector<16x16xi32>
    %75 = arith.addi %64, %74 : vector<16x16xi32>
    %76 = arith.select %73, %75, %64 : vector<16x16xi1>, vector<16x16xi32>
    %77 = arith.cmpi eq, %60, %76 : vector<16x16xi32>
    %cst_22 = arith.constant 0.000000e+00 : f32
    %cst_23 = arith.constant -1.000000e+09 : f32
    %78 = vector.broadcast %cst_22 : f32 to vector<16x16xf32>
    %79 = vector.broadcast %cst_23 : f32 to vector<16x16xf32>
    %80 = arith.select %77, %78, %79 : vector<16x16xi1>, vector<16x16xf32>
    %81 = vector.shape_cast %80 : vector<16x16xf32> to vector<1x16x16xf32>
    %82 = vector.broadcast %81 : vector<1x16x16xf32> to vector<4x16x16xf32>
    %83 = arith.addf %42, %82 : vector<4x16x16xf32>
    %cst_24 = arith.constant dense<0xFF800000> : vector<4x16xf32>
    %84 = vector.multi_reduction <maximumf>, %83, %cst_24 [2] : vector<4x16x16xf32> to vector<4x16xf32>
    %85 = vector.shape_cast %84 : vector<4x16xf32> to vector<4x16x1xf32>
    %86 = vector.broadcast %85 : vector<4x16x1xf32> to vector<4x16x16xf32>
    %87 = arith.subf %83, %86 : vector<4x16x16xf32>
    %88 = math.exp %87 : vector<4x16x16xf32>
    %cst_25 = arith.constant dense<0.000000e+00> : vector<4x16xf32>
    %89 = vector.multi_reduction <add>, %88, %cst_25 [2] : vector<4x16x16xf32> to vector<4x16xf32>
    %90 = vector.shape_cast %89 : vector<4x16xf32> to vector<4x16x1xf32>
    %91 = vector.broadcast %90 : vector<4x16x1xf32> to vector<4x16x16xf32>
    %92 = arith.divf %88, %91 : vector<4x16x16xf32>
    "tpu.trace_start"() <{level = 10 : i32, message = "hdk,hqk->hdq"}> : () -> ()
    %cst_26 = arith.constant dense<0.000000e+00> : vector<4x8x16xf32>
    %93 = tpu.matmul %40, %92, %cst_26 {dimension_numbers = #tpu.dot_dimension_numbers<[2], [2], [1], [1], [0, 0, 0, 1, 1, 1], [0], [0]>} : vector<4x8x16xf32>, vector<4x16x16xf32>, vector<4x8x16xf32> -> vector<4x8x16xf32>
    "tpu.trace_stop"() : () -> ()
    %94 = vector.shape_cast %93 : vector<4x8x16xf32> to vector<32x16xf32>
    %95 = tpu.transpose %94, [1, 0] : vector<32x16xf32> -> vector<16x32xf32>
    %cst_27 = arith.constant dense<0.000000e+00> : vector<16x32xf32>
    %96 = tpu.matmul %95, %12, %cst_27 {dimension_numbers = #tpu.dot_dimension_numbers<[1], [0], [0], [1], [0, 0, 1, 1], [], []>} : vector<16x32xf32>, vector<32x32xf32>, vector<16x32xf32> -> vector<16x32xf32>
    %97 = vector.broadcast %3 : vector<1x32xf32> to vector<16x32xf32>
    %98 = arith.addf %96, %97 : vector<16x32xf32>
    %99 = arith.addf %0, %98 : vector<16x32xf32>
    %cst_28 = arith.constant dense<0.000000e+00> : vector<16xf32>
    %100 = vector.multi_reduction <add>, %99, %cst_28 [1] : vector<16x32xf32> to vector<16xf32>
    %101 = vector.shape_cast %100 : vector<16xf32> to vector<16x1xf32>
    %cst_29 = arith.constant 3.200000e+01 : f32
    %102 = vector.broadcast %cst_29 : f32 to vector<16x1xf32>
    %103 = arith.divf %101, %102 : vector<16x1xf32>
    %104 = vector.broadcast %103 : vector<16x1xf32> to vector<16x32xf32>
    %105 = arith.subf %99, %104 : vector<16x32xf32>
    %106 = arith.mulf %105, %105 : vector<16x32xf32>
    %cst_30 = arith.constant dense<0.000000e+00> : vector<16xf32>
    %107 = vector.multi_reduction <add>, %106, %cst_30 [1] : vector<16x32xf32> to vector<16xf32>
    %108 = vector.shape_cast %107 : vector<16xf32> to vector<16x1xf32>
    %cst_31 = arith.constant 3.200000e+01 : f32
    %109 = vector.broadcast %cst_31 : f32 to vector<16x1xf32>
    %110 = arith.divf %108, %109 : vector<16x1xf32>
    %cst_32 = arith.constant 9.99999974E-6 : f32
    %111 = vector.broadcast %cst_32 : f32 to vector<16x1xf32>
    %112 = arith.addf %110, %111 : vector<16x1xf32>
    %113 = math.rsqrt %112 : vector<16x1xf32>
    %114 = vector.broadcast %113 : vector<16x1xf32> to vector<16x32xf32>
    %115 = arith.mulf %105, %114 : vector<16x32xf32>
    %116 = vector.broadcast %8 : vector<1x32xf32> to vector<16x32xf32>
    %117 = arith.mulf %115, %116 : vector<16x32xf32>
    %118 = vector.broadcast %9 : vector<1x32xf32> to vector<16x32xf32>
    %119 = arith.addf %117, %118 : vector<16x32xf32>
    %cst_33 = arith.constant dense<0.000000e+00> : vector<16x128xf32>
    %120 = tpu.matmul %119, %10, %cst_33 {dimension_numbers = #tpu.dot_dimension_numbers<[1], [0], [0], [1], [0, 0, 1, 1], [], []>} : vector<16x32xf32>, vector<32x128xf32>, vector<16x128xf32> -> vector<16x128xf32>
    %121 = vector.broadcast %4 : vector<1x128xf32> to vector<16x128xf32>
    %122 = arith.addf %120, %121 : vector<16x128xf32>
    %cst_34 = arith.constant 0.000000e+00 : f32
    %123 = vector.broadcast %cst_34 : f32 to vector<16x128xf32>
    %124 = arith.maximumf %122, %123 : vector<16x128xf32>
    %c0_35 = arith.constant 0 : index
    %c0_36 = arith.constant 0 : index
    %125 = vector.load %arg2[%c0_35, %c0_36] : memref<128x32xf32, #tpu.memory_space<vmem>>, vector<128x32xf32>
    %cst_37 = arith.constant dense<0.000000e+00> : vector<16x32xf32>
    %126 = tpu.matmul %124, %125, %cst_37 {dimension_numbers = #tpu.dot_dimension_numbers<[1], [0], [0], [1], [0, 0, 1, 1], [], []>} : vector<16x128xf32>, vector<128x32xf32>, vector<16x32xf32> -> vector<16x32xf32>
    %127 = vector.broadcast %5 : vector<1x32xf32> to vector<16x32xf32>
    %128 = arith.addf %126, %127 : vector<16x32xf32>
    %129 = arith.addf %99, %128 : vector<16x32xf32>
    %c0_38 = arith.constant 0 : index
    %c0_39 = arith.constant 0 : index
    %130 = vector.load %arg4[%c0_38, %c0_39] : memref<16x32xf32, #tpu.memory_space<vmem>>, vector<16x32xf32>
    tpu.vector_store %arg4[%c0_38, %c0_39], %129 {strides = array<i32>} : memref<16x32xf32, #tpu.memory_space<vmem>>, vector<16x32xf32>,
    return
  }
}

</mosaic_0001>

<bundles_post_ra>
// kernel: transformer_encoder_layer.1
= control target key start
LH: loop header
LB: loop body
LE: loop exit
PB: predicated region body
PF: predicated region fallthrough
CT: control target
= control target key end

     0   :  { %vm29_vm0 = vcmask 261120   ;;  %s1997_s0 = inlined_call_operand.vmem [shape: f32[16,32], index: 0, kind: input, shape index: {}]   ;;  %s1998_s1 = inlined_call_operand.vmem [shape: f32[32,256], index: 1, kind: input, shape index: {}]   ;;  %s1999_s2 = inlined_call_operand.vmem [shape: f32[128,32], index: 2, kind: input, shape index: {}]   ;;  %s2000_s3 = inlined_call_operand.vmem [shape: f32[8,128], index: 3, kind: input, shape index: {}]   ;;  %s2001_s4 = inlined_call_operand.hbm [shape: f32[16,32], index: 4, kind: output, shape index: {}]  }
   0x1   :  { %v1770_v0 = vld [vmem:[%s1997_s0] sm:$0xff]  ;;  %v1775_v1 = vld [vmem:[%s1997_s0 + $0x8] sm:$0xff] }
   0x2   :  { %9 = vsyncpa [#allocation3], 0  ;;  %v30_v2 = vsel %vm29_vm0, %v1770_v0, 0.0  ;;  %v33_v3 = vsel %vm29_vm0, %v1775_v1, 0.0  ;;  %v1788_v14 = vld [vmem:[%s1998_s1 + $0x38] sm:$0xff]  ;;  %v1793_v15 = vld [vmem:[%s1998_s1 + $0x28] sm:$0xff]  ;;  %v57_v23 = vlaneseq }
   0x3   :  { %31 = vadd.xlane.f32.xlu0 %v30_v2  ;;  %1550 = vmatprep.subr.mxu0 %v1788_v14  ;;  %v1800_v16 = vld [vmem:[%s1998_s1 + $0x18] sm:$0xff]  ;;  %v1809_v17 = vld [vmem:[%s1998_s1 + $0x8] sm:$0xff]  ;;  %v1820_v27 = vld [vmem:[%s2000_s3] sm:$0xff]  ;;  %vm359_vm1 = vcmask 64512   ;;  %vm684_vm4 = vcmask 130048   ;;  %vm1737_vm5 = vmmov 0  }
   0x4   :  { %1551 = vmatpush3.msra.mxu0 %v1788_v14  ;;  %v1814_v25 = vshrl.u32 %v57_v23, 7  ;;  %s1738_s3 = smov 32  }
   0x5   :  { %1552 = vmatprep.subr.mxu0 %v1793_v15 }
   0x6   :  { %1553 = vmatpush3.msra.mxu0 %v1793_v15  ;;  %v59_v26 = vsub.s32 4, %v1814_v25  ;;  %v65_v28 = vsub.s32 5, %v1814_v25  ;;  %v71_v39 = vsub.s32 0, %v1814_v25 }
   0x7   :  { %34 = vadd.xlane.f32.xlu0 %v33_v3  ;;  %1554 = vmatprep.subr.mxu0 %v1800_v16  ;;  %v316_v3 = vadd.s32 8, %v1814_v25 }
   0x8   :  { %1555 = vmatpush3.msra.mxu0 %v1800_v16  ;;  %v60_v29 = vrot.slane %v1820_v27, %v59_v26  ;;  %v66_v32 = vrot.slane %v1820_v27, %v65_v28  ;;  %v72_v41 = vrot.slane %v1820_v27, %v71_v39 }
   0x9   :  { %1556 = vmatprep.subr.mxu0 %v1809_v17 }
   0xa   :  { %1557 = vmatpush3.msra.mxu0 %v1809_v17 }
  0x8c   :  { %v32_v4 = vpop.xlane.xlu0 %31 }
  0x8d   :  { %v37_v5 = vmul.f32 0.03125, %v32_v4  ;;  %v318_v4 = vand.u32 127, %v57_v23 }
  0x8f   :  { %v39_v6 = vsub.f32 %v1770_v0, %v37_v5  ;;  %v330_v5 = vand.u32 1, %v316_v3 }
  0x90   :  { %v35_v7 = vpop.xlane.xlu0 %34 }
  0x91   :  { %v38_v8 = vmul.f32 0.03125, %v35_v7  ;;  %v41_v9 = vmul.f32 %v39_v6, %v39_v6  ;;  %v323_v7 = vand.u32 1, %v1814_v25 }
  0x93   :  { %v40_v10 = vsub.f32 %v1775_v1, %v38_v8  ;;  %v43_v11 = vsel %vm29_vm0, %v41_v9, 0.0  ;;  %v1735_v8 = vmov -1e+09  }
  0x94   :  { %44 = vadd.xlane.f32.xlu1 %v43_v11 }
  0x95   :  { %v42_v12 = vmul.f32 %v40_v10, %v40_v10 }
  0x97   :  { %v46_v13 = vsel %vm29_vm0, %v42_v12, 0.0 }
  0x98   :  { %47 = vadd.xlane.f32.xlu1 %v46_v13 }
 0x11d   :  { %v45_v18 = vpop.xlane.xlu1 %44 }
 0x11e   :  { %v49_v19 = vmul.f32 0.03125, %v45_v18 }
 0x120   :  { %v51_v20 = vadd.f32 1e-05, %v49_v19 }
 0x121   :  { %v48_v21 = vpop.xlane.xlu1 %47 }
 0x122   :  { %1673 = vrsqrt.f32 %v51_v20  ;;  %v50_v22 = vmul.f32 0.03125, %v48_v21 }
 0x124   :  { %v52_v24 = vadd.f32 1e-05, %v50_v22 }
 0x126   :  { %1675 = vrsqrt.f32 %v52_v24 }
 0x12f   :  { %v1674_v30 = vpop.eup %1673 }
 0x130   :  { %v55_v31 = vmul.f32 %v1674_v30, %v39_v6  ;;  %v347_v6 = vand.u32 1, %v318_v4 }
 0x132   :  { %v61_v33 = vmul.f32 %v60_v29, %v55_v31  ;;  %vm356_vm2 = vcmp.eq.s32.totalorder %v330_v5, %v347_v6  ;;  %vm355_vm3 = vcmp.eq.s32.totalorder %v323_v7, %v347_v6 }
 0x133   :  { %v1676_v34 = vpop.eup %1675  ;;  %v358_v9 = vsel %vm356_vm2, 0.0, %v1735_v8  ;;  %v357_v11 = vsel %vm355_vm3, 0.0, %v1735_v8 }
 0x134   :  { %v56_v35 = vmul.f32 %v1676_v34, %v40_v10  ;;  %v67_v36 = vadd.f32 %v66_v32, %v61_v33 }
 0x136   :  { %v62_v37 = vmul.f32 %v60_v29, %v56_v35  ;;  %1558 = vmatprep.mubr.msk.f32.mxu0 %vm29_vm0, %v67_v36 }
 0x138   :  { %v68_v38 = vadd.f32 %v66_v32, %v62_v37 }
 0x13a   :  { %1559 = vmatmul.mubr.msk.f32.vlgmr.msra.gmra.mxu0 %vm29_vm0, %v68_v38 }
 0x1fa   :  { %v1560_v40 = vpop.f32.mrf.mxu0 }
 0x1fb   :  { %v151_v44 = vadd.f32 %v1560_v40, %v72_v41 }
 0x1fc   :  { %v145_v42 = vpop.f32.mrf.mxu0 }
 0x1fd   :  { %v146_v43 = vadd.f32 %v145_v42, %v72_v41 }
 0x1ff   :  { %154 = vxpose.xlu0.b32.start [1/2] (short) (narrow) %v146_v43, 96 }
 0x203   :  { %155 = vxpose.xlu0.b32.end [2/2] (short) (narrow) %v151_v44, 96 }
 0x27b   :  { %v170_v45 = vpop.trf.xlu0 }
 0x27c   :  { %186 = vxpose.xlu1.b32.start.end [1/1] (short) (narrow) %v170_v45, 16 }
 0x27f   :  { %v171_v46 = vpop.trf.xlu0 }
 0x280   :  { %218 = vxpose.xlu0.b32.start.end [1/1] (short) (narrow) %v171_v46, 16 }
 0x283   :  { %v172_v47 = vpop.trf.xlu0 }
 0x284   :  { %250 = vxpose.xlu1.b32.start.end [1/1] (short) (narrow) %v172_v47, 16 }
 0x287   :  { %v173_v48 = vpop.trf.xlu0 }
 0x289   :  { %282 = vxpose.xlu1.b32.start.end [1/1] (short) (narrow) %v173_v48, 16 }
 0x28b   :  { %v174_v49 = vpop.trf.xlu0 }
 0x28c   :  { %1561 = vmatprep.subr.mxu1 %v174_v49 }
 0x28d   :  { %1562 = vmatpush3.msra.mxu1 %v174_v49 }
 0x28f   :  { %v175_v50 = vpop.trf.xlu0 }
 0x290   :  { %1566 = vmatprep.subr.mxu1 %v175_v50 }
 0x293   :  { %v176_v51 = vpop.trf.xlu0 }
 0x297   :  { %v177_v52 = vpop.trf.xlu0 }
 0x298   :  { %1576 = vmatprep.subr.mxu0 %v177_v52 }
 0x299   :  { %1577 = vmatpush3.msra.mxu0 %v177_v52 }
 0x29b   :  { %v1829_v53 = vpop.trf.xlu0 }
 0x29f   :  { %v1831_v54 = vpop.trf.xlu0 }
 0x2a3   :  { %v1833_v55 = vpop.trf.xlu0 }
 0x2a7   :  { %v1835_v56 = vpop.trf.xlu0 }
 0x2f8   :  { %v202_v57 = vpop.trf.xlu1 }
 0x2f9   :  { %1563 = vmatprep.mubr.msk.f32.mxu1 %vm359_vm1, %v202_v57 }
 0x2fc   :  { %v203_v58 = vpop.trf.xlu1  ;;  %v234_v59 = vpop.trf.xlu0 }
 0x2fd   :  { %1564 = vmatmul.mubr.msk.f32.vlgmr.msra.gmra.mxu1 %vm359_vm1, %v203_v58 }
 0x2fe   :  { %1567 = vmatpush3.msra.mxu1 %v175_v50  ;;  %1568 = vmatprep.mubr.msk.f32.mxu1 %vm359_vm1, %v234_v59 }
 0x2ff   :  { %1571 = vmatprep.subr.mxu1 %v176_v51 }
 0x300   :  { %v235_v60 = vpop.trf.xlu0  ;;  %v266_v61 = vpop.trf.xlu1 }
 0x301   :  { %1569 = vmatmul.mubr.msk.f32.vlgmr.msra.gmra.mxu1 %vm359_vm1, %v235_v60 }
 0x302   :  { %1572 = vmatpush3.msra.mxu1 %v176_v51  ;;  %1573 = vmatprep.mubr.msk.f32.mxu1 %vm359_vm1, %v266_v61 }
 0x304   :  { %v267_v62 = vpop.trf.xlu1 }
 0x305   :  { %1574 = vmatmul.mubr.msk.f32.vlgmr.msra.gmra.mxu1 %vm359_vm1, %v267_v62 }
 0x308   :  { %v298_v63 = vpop.trf.xlu1 }
 0x309   :  { %1578 = vmatprep.mubr.msk.f32.mxu0 %vm359_vm1, %v298_v63 }
 0x30c   :  { %v299_v2 = vpop.trf.xlu1 }
 0x30d   :  { %1579 = vmatmul.mubr.msk.f32.vlgmr.msra.gmra.mxu0 %vm359_vm1, %v299_v2 }
 0x3bd   :  { %v1565_v10 = vpop.f32.mrf.mxu1 }
 0x3be   :  { %v438_v12 = vadd.f32 %v1565_v10, %v358_v9 }
 0x3bf   :  { %v432_v13 = vpop.f32.mrf.mxu1 }
 0x3c0   :  { %v433_v18 = vadd.f32 %v432_v13, %v357_v11  ;;  %v688_v19 = vsel %vm684_vm4, %v438_v12, -inf }
 0x3c1   :  { %689 = vmax.xlane.f32.xlu1 %v688_v19  ;;  %v1570_v20 = vpop.f32.mrf.mxu1 }
 0x3c2   :  { %v519_v21 = vadd.f32 %v1570_v20, %v358_v9  ;;  %v685_v22 = vsel %vm684_vm4, %v433_v18, -inf }
 0x3c3   :  { %686 = vmax.xlane.f32.xlu0 %v685_v22  ;;  %v513_v23 = vpop.f32.mrf.mxu1 }
 0x3c4   :  { %v694_v24 = vsel %vm684_vm4, %v519_v21, -inf  ;;  %v514_v26 = vadd.f32 %v513_v23, %v357_v11 }
 0x3c5   :  { %695 = vmax.xlane.f32.xlu1 %v694_v24  ;;  %v1575_v28 = vpop.f32.mrf.mxu1 }
 0x3c6   :  { %v600_v29 = vadd.f32 %v1575_v28, %v358_v9  ;;  %v691_v30 = vsel %vm684_vm4, %v514_v26, -inf }
 0x3c7   :  { %v594_v31 = vpop.f32.mrf.mxu1 }
 0x3c8   :  { %v595_v32 = vadd.f32 %v594_v31, %v357_v11  ;;  %v700_v33 = vsel %vm684_vm4, %v600_v29, -inf }
 0x3c9   :  { %692 = vmax.xlane.f32.xlu1 %v691_v30 }
 0x3ca   :  { %v697_v36 = vsel %vm684_vm4, %v595_v32, -inf }
 0x3cd   :  { %701 = vmax.xlane.f32.xlu1 %v700_v33  ;;  %v1580_v34 = vpop.f32.mrf.mxu0 }
 0x3ce   :  { %v681_v35 = vadd.f32 %v1580_v34, %v358_v9 }
 0x3cf   :  { %v675_v37 = vpop.f32.mrf.mxu0 }
 0x3d0   :  { %v676_v38 = vadd.f32 %v675_v37, %v357_v11  ;;  %v706_v39 = vsel %vm684_vm4, %v681_v35, -inf }
 0x3d1   :  { %698 = vmax.xlane.f32.xlu1 %v697_v36 }
 0x3d2   :  { %v703_v40 = vsel %vm684_vm4, %v676_v38, -inf }
 0x3d5   :  { %707 = vmax.xlane.f32.xlu1 %v706_v39 }
 0x3d9   :  { %704 = vmax.xlane.f32.xlu1 %v703_v40 }
 0x44a   :  { %v690_v41 = vpop.xlane.xlu1 %689 }
 0x44b   :  { %v710_v42 = vsub.f32 %v438_v12, %v690_v41 }
 0x44c   :  { %v687_v43 = vpop.xlane.xlu0 %686 }
 0x44d   :  { %v719_v44 = vmul.f32 1.442695, %v710_v42  ;;  %v709_v45 = vsub.f32 %v433_v18, %v687_v43 }
 0x44e   :  { %v696_v46 = vpop.xlane.xlu1 %695 }
 0x44f   :  { %1677 = vpow2.f32 %v719_v44  ;;  %v717_v47 = vmul.f32 1.442695, %v709_v45  ;;  %v712_v48 = vsub.f32 %v519_v21, %v696_v46 }
 0x451   :  { %1679 = vpow2.f32 %v717_v47  ;;  %v723_v49 = vmul.f32 1.442695, %v712_v48 }
 0x452   :  { %v693_v50 = vpop.xlane.xlu1 %692 }
 0x453   :  { %v711_v51 = vsub.f32 %v514_v26, %v693_v50  ;;  %1681 = vpow2.f32 %v723_v49 }
 0x455   :  { %v721_v52 = vmul.f32 1.442695, %v711_v51 }
 0x456   :  { %v702_v57 = vpop.xlane.xlu1 %701 }
 0x457   :  { %1683 = vpow2.f32 %v721_v52  ;;  %v714_v58 = vsub.f32 %v600_v29, %v702_v57  ;;  %v1736_v29 = vmov 0.0  }
 0x458   :  { %1581 = vmatprep.subr.mxu0 %v1736_v29  ;;  %1585 = vmatprep.mubr.msk.f32.mxu0 %vm1737_vm5, %v1736_v29 }
 0x459   :  { %v727_v59 = vmul.f32 1.442695, %v714_v58 }
 0x45a   :  { %v699_v60 = vpop.xlane.xlu1 %698 }
 0x45b   :  { %1685 = vpow2.f32 %v727_v59  ;;  %v713_v61 = vsub.f32 %v595_v32, %v699_v60 }
 0x45c   :  { %v1678_v62 = vpop.eup %1677 }
 0x45d   :  { %v725_v63 = vmul.f32 1.442695, %v713_v61  ;;  %v736_v2 = vsel %vm684_vm4, %v1678_v62, 0.0 }
 0x45e   :  { %v1680_v3 = vpop.eup %1679  ;;  %737 = vadd.xlane.f32.xlu1 %v736_v2  ;;  %v708_v4 = vpop.xlane.xlu1 %707  ;;  %v1123_v2 = vsub.s32 1, %v1814_v25 }
 0x45f   :  { %1687 = vpow2.f32 %v725_v63  ;;  %v716_v5 = vsub.f32 %v681_v35, %v708_v4  ;;  %v733_v7 = vsel %vm684_vm4, %v1680_v3, 0.0 }
 0x460   :  { %v1682_v8 = vpop.eup %1681 }
 0x461   :  { %v731_v6 = vmul.f32 1.442695, %v716_v5  ;;  %v742_v18 = vsel %vm684_vm4, %v1682_v8, 0.0 }
 0x462   :  { %v705_v9 = vpop.xlane.xlu1 %704  ;;  %734 = vadd.xlane.f32.xlu1 %v733_v7 }
 0x463   :  { %1689 = vpow2.f32 %v731_v6  ;;  %v715_v10 = vsub.f32 %v676_v38, %v705_v9 }
 0x464   :  { %v1684_v11 = vpop.eup %1683 }
 0x465   :  { %v729_v12 = vmul.f32 1.442695, %v715_v10  ;;  %v739_v13 = vsel %vm684_vm4, %v1684_v11, 0.0 }
 0x466   :  { %740 = vadd.xlane.f32.xlu0 %v739_v13  ;;  %743 = vadd.xlane.f32.xlu1 %v742_v18 }
 0x467   :  { %1691 = vpow2.f32 %v729_v12 }
 0x468   :  { %v1686_v19 = vpop.eup %1685 }
 0x469   :  { %v748_v20 = vsel %vm684_vm4, %v1686_v19, 0.0 }
 0x46a   :  { %749 = vadd.xlane.f32.xlu1 %v748_v20 }
 0x46c   :  { %v1688_v21 = vpop.eup %1687 }
 0x46d   :  { %v745_v22 = vsel %vm684_vm4, %v1688_v21, 0.0 }
 0x46e   :  { %746 = vadd.xlane.f32.xlu0 %v745_v22 }
 0x470   :  { %v1690_v23 = vpop.eup %1689 }
 0x471   :  { %v754_v24 = vsel %vm684_vm4, %v1690_v23, 0.0 }
 0x472   :  { %755 = vadd.xlane.f32.xlu1 %v754_v24  ;;  %v24_v24 = vld [vmem:[%s1998_s1 + $0x30] sm:$0xff] }
 0x474   :  { %v1863_v26 = vpop.eup %1691 }
 0x475   :  { %v751_v28 = vsel %vm684_vm4, %v1863_v26, 0.0 }
 0x476   :  { %752 = vadd.xlane.f32.xlu0 %v751_v28  ;;  %v22_v28 = vld [vmem:[%s1998_s1 + $0x10] sm:$0xff] }
 0x483   :  { %1135 = vrot.lane.b32.xlu1 %v1788_v14, %s1738_s3 }
 0x487   :  { %1131 = vrot.lane.b32.xlu1 %v1800_v16, %s1738_s3 }
 0x48b   :  { %1129 = vrot.lane.b32.xlu1 %v1809_v17, %s1738_s3 }
 0x48c   :  { %1133 = vrot.lane.b32.xlu0 %v1793_v15, %s1738_s3 }
 0x4e7   :  { %v738_v30 = vpop.xlane.xlu1 %737 }
 0x4e8   :  { %1693 = vrcp.f32 %v738_v30  ;;  %v1364_v30 = vld [vmem:[%s1999_s2 + $0x78] sm:$0xff] }
 0x4eb   :  { %v735_v31 = vpop.xlane.xlu1 %734 }
 0x4ec   :  { %1695 = vrcp.f32 %v735_v31  ;;  %v1363_v31 = vld [vmem:[%s1999_s2 + $0x70] sm:$0xff] }
 0x4ef   :  { %v744_v32 = vpop.xlane.xlu1 %743  ;;  %v741_v33 = vpop.xlane.xlu0 %740 }
 0x4f0   :  { %1697 = vrcp.f32 %v744_v32  ;;  %v1362_v32 = vld [vmem:[%s1999_s2 + $0x68] sm:$0xff] }
 0x4f1   :  { %1699 = vrcp.f32 %v741_v33  ;;  %v1361_v33 = vld [vmem:[%s1999_s2 + $0x60] sm:$0xff] }
 0x4f3   :  { %v750_v34 = vpop.xlane.xlu1 %749 }
 0x4f4   :  { %1701 = vrcp.f32 %v750_v34  ;;  %v1360_v34 = vld [vmem:[%s1999_s2 + $0x58] sm:$0xff] }
 0x4f5   :  { %v1694_v35 = vpop.eup %1693 }
 0x4f6   :  { %v760_v36 = vmul.f32 %v1694_v35, %v1678_v62  ;;  %v1359_v35 = vld [vmem:[%s1999_s2 + $0x50] sm:$0xff] }
 0x4f7   :  { %v747_v37 = vpop.xlane.xlu0 %746 }
 0x4f8   :  { %1582 = vmatpush3.xpose.msk.msra.mxu0 %vm684_vm4, %v760_v36  ;;  %1703 = vrcp.f32 %v747_v37  ;;  %v1358_v36 = vld [vmem:[%s1999_s2 + $0x48] sm:$0xff]  ;;  %v1357_v37 = vld [vmem:[%s1999_s2 + $0x40] sm:$0xff] }
 0x4f9   :  { %v1696_v14 = vpop.eup %1695  ;;  %1583 = vmatprep.subr.mxu0 %v1736_v29 }
 0x4fa   :  { %v758_v15 = vmul.f32 %v1696_v14, %v1680_v3  ;;  %v1124_v3 = vrot.slane %v1820_v27, %v1123_v2  ;;  %v1356_v14 = vld [vmem:[%s1999_s2 + $0x38] sm:$0xff] }
 0x4fb   :  { %v756_v16 = vpop.xlane.xlu1 %755 }
 0x4fc   :  { %1584 = vmatpush3.xpose.msk.msra.mxu0 %vm684_vm4, %v758_v15  ;;  %1705 = vrcp.f32 %v756_v16  ;;  %v1355_v15 = vld [vmem:[%s1999_s2 + $0x30] sm:$0xff]  ;;  %v1354_v16 = vld [vmem:[%s1999_s2 + $0x28] sm:$0xff] }
 0x4fd   :  { %v1698_v17 = vpop.eup %1697  ;;  %1588 = vmatprep.subr.mxu0 %v1736_v29 }
 0x4fe   :  { %v764_v38 = vmul.f32 %v1698_v17, %v1682_v8  ;;  %v1700_v39 = vpop.eup %1699  ;;  %v1353_v17 = vld [vmem:[%s1999_s2 + $0x20] sm:$0xff] }
 0x4ff   :  { %1586 = vmatmul.mubr.msk.f32.vlgmr.msra.gmra.mxu0 %vm684_vm4, %v1829_v53  ;;  %v753_v40 = vpop.xlane.xlu0 %752  ;;  %v762_v41 = vmul.f32 %v1700_v39, %v1684_v11  ;;  %v1136_v48 = vpop.permute.xlu1 %1135 }
 0x500   :  { %1589 = vmatpush3.xpose.msk.msra.mxu0 %vm684_vm4, %v764_v38  ;;  %1592 = vmatprep.mubr.msk.f32.mxu0 %vm1737_vm5, %v1736_v29  ;;  %1707 = vrcp.f32 %v753_v40 }
 0x501   :  { %1590 = vmatprep.subr.mxu0 %v1736_v29  ;;  %v1702_v42 = vpop.eup %1701  ;;  %1609 = vmatprep.subr.mxu1 %v1136_v48 }
 0x502   :  { %v768_v43 = vmul.f32 %v1702_v42, %v1686_v19  ;;  %1610 = vmatpush3.msra.mxu1 %v1136_v48 }
 0x503   :  { %v1134_v49 = vpop.permute.xlu0 %1133  ;;  %v1132_v50 = vpop.permute.xlu1 %1131 }
 0x504   :  { %1591 = vmatpush3.xpose.msk.msra.mxu0 %vm684_vm4, %v762_v41  ;;  %1611 = vmatprep.subr.mxu1 %v1134_v49 }
 0x505   :  { %1595 = vmatprep.subr.mxu0 %v1736_v29  ;;  %v1704_v44 = vpop.eup %1703  ;;  %1612 = vmatpush3.msra.mxu1 %v1134_v49 }
 0x506   :  { %v766_v53 = vmul.f32 %v1704_v44, %v1688_v21  ;;  %1613 = vmatprep.subr.mxu1 %v1132_v50  ;;  %v1252_v44 = vsub.s32 6, %v1814_v25 }
 0x507   :  { %1593 = vmatmul.mubr.msk.f32.vlgmr.msra.gmra.mxu0 %vm684_vm4, %v1831_v54  ;;  %1614 = vmatpush3.msra.mxu1 %v1132_v50  ;;  %v1130_v57 = vpop.permute.xlu1 %1129 }
 0x508   :  { %1596 = vmatpush3.xpose.msk.msra.mxu0 %vm684_vm4, %v768_v43  ;;  %1599 = vmatprep.mubr.msk.f32.mxu0 %vm1737_vm5, %v1736_v29 }
 0x509   :  { %1597 = vmatprep.subr.mxu0 %v1736_v29  ;;  %v1706_v45 = vpop.eup %1705  ;;  %1615 = vmatprep.subr.mxu1 %v1130_v57 }
 0x50a   :  { %v772_v46 = vmul.f32 %v1706_v45, %v1690_v23  ;;  %1616 = vmatpush3.msra.mxu1 %v1130_v57  ;;  %v1253_v45 = vrot.slane %v1820_v27, %v1252_v44  ;;  %v1352_v57 = vld [vmem:[%s1999_s2 + $0x18] sm:$0xff] }
 0x50b   :  { %1631 = vmatprep.subr.mxu1 %v1364_v30 }
 0x50c   :  { %1598 = vmatpush3.xpose.msk.msra.mxu0 %vm684_vm4, %v766_v53  ;;  %v1258_v53 = vsub.s32 7, %v1814_v25 }
 0x50d   :  { %1602 = vmatprep.subr.mxu0 %v1736_v29  ;;  %v1708_v47 = vpop.eup %1707 }
 0x50e   :  { %v770_v54 = vmul.f32 %v1708_v47, %v1863_v26  ;;  %v23_v26 = vld [vmem:[%s1998_s1 + $0x20] sm:$0xff] }
 0x50f   :  { %1600 = vmatmul.mubr.msk.f32.vlgmr.msra.gmra.mxu0 %vm684_vm4, %v1833_v55 }
 0x510   :  { %1603 = vmatpush3.xpose.msk.msra.mxu0 %vm684_vm4, %v772_v46  ;;  %1606 = vmatprep.mubr.msk.f32.mxu0 %vm1737_vm5, %v1736_v29 }
 0x511   :  { %1604 = vmatprep.subr.mxu0 %v1736_v29  ;;  %v21_v29 = vld [vmem:[%s1998_s1] sm:$0xff] }
 0x514   :  { %1605 = vmatpush3.xpose.msk.msra.mxu0 %vm684_vm4, %v770_v54  ;;  %v1259_v54 = vrot.slane %v1820_v27, %v1258_v53 }
 0x515   :  { %1620 = vmatprep.subr.mxu0 %v24_v24 }
 0x517   :  { %1607 = vmatmul.mubr.msk.f32.vlgmr.msra.gmra.mxu0 %vm684_vm4, %v1835_v56 }
 0x518   :  { %1621 = vmatpush3.msra.mxu0 %v24_v24 }
 0x519   :  { %1622 = vmatprep.subr.mxu0 %v23_v26 }
 0x51a   :  { %1623 = vmatpush3.msra.mxu0 %v23_v26 }
 0x51b   :  { %1624 = vmatprep.subr.mxu0 %v22_v28 }
 0x51c   :  { %1625 = vmatpush3.msra.mxu0 %v22_v28 }
 0x51d   :  { %1626 = vmatprep.subr.mxu0 %v21_v29 }
 0x51e   :  { %1627 = vmatpush3.msra.mxu0 %v21_v29 }
 0x5bf   :  { %v848_v55 = vpop.f32.mrf.mxu0 }
 0x5c0   :  { %1089 = vxpose.xlu0.b32.start [1/4] (short) (narrow) %v848_v55, 16 }
 0x5c1   :  { %v1587_v51 = vpop.f32.mrf.mxu0 }
 0x5c7   :  { %v927_v52 = vpop.f32.mrf.mxu0 }
 0x5c8   :  { %1090 = vxpose.xlu0.b32.cont [2/4] (short) (narrow) %v927_v52, 16 }
 0x5c9   :  { %v1594_v58 = vpop.f32.mrf.mxu0 }
 0x5ca   :  { %v1351_v58 = vld [vmem:[%s1999_s2 + $0x10] sm:$0xff] }
 0x5cf   :  { %v1006_v59 = vpop.f32.mrf.mxu0 }
 0x5d0   :  { %1091 = vxpose.xlu0.b32.cont [3/4] (short) (narrow) %v1006_v59, 16  ;;  %v1350_v59 = vld [vmem:[%s1999_s2 + $0x8] sm:$0xff] }
 0x5d1   :  { %v1601_v56 = vpop.f32.mrf.mxu0 }
 0x5d2   :  { %v1349_v56 = vld [vmem:[%s1999_s2] sm:$0xff]  ;;  %s1739_s2 = smov [#allocation2]  }
 0x5d3   :  { %s1453_s13 = sshll.u32 %s1739_s2, 4  ;;  %s1454_s13 = int_to_ptr.vmem [resolvable:$true] %s1453_s13 }
 0x5d4   :  { %s1713_s14 = scalar_lea.vmem %s1454_s13, 256  ;;  %p1718_p1 = scmp.lt.s32.totalorder %s1454_s13, %s1454_s13 }
 0x5d5   :  { %p1714_p0 = scmp.ne.s32.totalorder %s1454_s13, %s1713_s14  ;;  %p1719_p2 = scmp.lt.s32.totalorder %s1713_s14, %s1713_s14 }
 0x5d7   :  { %v1085_v60 = vpop.f32.mrf.mxu0  ;;  %p1720_p3 = por %p1719_p2, %p1718_p1 }
 0x5d8   :  { %1092 = vxpose.xlu0.b32.end [4/4] (short) (narrow) %v1085_v60, 16  ;;  %v1264_v60 = vsub.s32 2, %v1814_v25 }
 0x5d9   :  { %v1608_v61 = vpop.f32.mrf.mxu0  ;;  %p1721_p4 = pnand %p1720_p3, %p1714_p0 }
 0x5da   :  { %v1265_v61 = vrot.slane %v1820_v27, %v1264_v60 }
 0x648   :  { %v1105_v62 = vpop.trf.xlu0 }
 0x649   :  { %1617 = vmatprep.mubr.msk.f32.mxu1 %vm29_vm0, %v1105_v62 }
 0x64c   :  { %v1106_v63 = vpop.trf.xlu0 }
 0x64d   :  { %1618 = vmatmul.mubr.msk.f32.vlgmr.msra.gmra.mxu1 %vm29_vm0, %v1106_v63 }
 0x64e   :  { %1632 = vmatpush3.msra.mxu1 %v1364_v30 }
 0x64f   :  { %1633 = vmatprep.subr.mxu1 %v1363_v31 }
 0x650   :  { %1634 = vmatpush3.msra.mxu1 %v1363_v31 }
 0x651   :  { %1635 = vmatprep.subr.mxu1 %v1362_v32 }
 0x652   :  { %1636 = vmatpush3.msra.mxu1 %v1362_v32 }
 0x653   :  { %1637 = vmatprep.subr.mxu1 %v1361_v33 }
 0x654   :  { %1638 = vmatpush3.msra.mxu1 %v1361_v33 }
 0x655   :  { %1639 = vmatprep.subr.mxu1 %v1360_v34 }
 0x656   :  { %1640 = vmatpush3.msra.mxu1 %v1360_v34 }
 0x657   :  { %1641 = vmatprep.subr.mxu1 %v1359_v35 }
 0x658   :  { %1642 = vmatpush3.msra.mxu1 %v1359_v35 }
 0x659   :  { %1643 = vmatprep.subr.mxu1 %v1358_v36 }
 0x65a   :  { %1644 = vmatpush3.msra.mxu1 %v1358_v36 }
 0x65b   :  { %1645 = vmatprep.subr.mxu1 %v1357_v37 }
 0x65c   :  { %1646 = vmatpush3.msra.mxu1 %v1357_v37 }
 0x65d   :  { %1647 = vmatprep.subr.mxu1 %v1356_v14 }
 0x65e   :  { %1648 = vmatpush3.msra.mxu1 %v1356_v14 }
 0x65f   :  { %1649 = vmatprep.subr.mxu1 %v1355_v15 }
 0x660   :  { %1650 = vmatpush3.msra.mxu1 %v1355_v15 }
 0x661   :  { %1651 = vmatprep.subr.mxu1 %v1354_v16 }
 0x662   :  { %1652 = vmatpush3.msra.mxu1 %v1354_v16 }
 0x663   :  { %1653 = vmatprep.subr.mxu1 %v1353_v17 }
 0x664   :  { %1654 = vmatpush3.msra.mxu1 %v1353_v17 }
 0x665   :  { %1655 = vmatprep.subr.mxu1 %v1352_v57 }
 0x666   :  { %1656 = vmatpush3.msra.mxu1 %v1352_v57 }
 0x667   :  { %1657 = vmatprep.subr.mxu1 %v1351_v58 }
 0x668   :  { %1658 = vmatpush3.msra.mxu1 %v1351_v58 }
 0x669   :  { %1659 = vmatprep.subr.mxu1 %v1350_v59 }
 0x66a   :  { %1660 = vmatpush3.msra.mxu1 %v1350_v59 }
 0x66b   :  { %1661 = vmatprep.subr.mxu1 %v1349_v56 }
 0x66c   :  { %1662 = vmatpush3.msra.mxu1 %v1349_v56 }
 0x70d   :  { %v1619_v4 = vpop.f32.mrf.mxu1 }
 0x70e   :  { %v1219_v6 = vadd.f32 %v1619_v4, %v1124_v3 }
 0x70f   :  { %v1213_v5 = vpop.f32.mrf.mxu1 }
 0x710   :  { %v1214_v7 = vadd.f32 %v1213_v5, %v1124_v3  ;;  %v1900_v9 = vadd.f32 %v1219_v6, %v1775_v1  ;;  %v1367_v6 = vsub.s32 3, %v1814_v25 }
 0x712   :  { %v1897_v8 = vadd.f32 %v1214_v7, %v1770_v0  ;;  %v1227_v11 = vsel %vm29_vm0, %v1900_v9, 0.0  ;;  %v1368_v7 = vrot.slane %v1820_v27, %v1367_v6 }
 0x714   :  { %v1224_v10 = vsel %vm29_vm0, %v1897_v8, 0.0 }
 0x715   :  { %1225 = vadd.xlane.f32.xlu1 %v1224_v10 }
 0x719   :  { %1228 = vadd.xlane.f32.xlu1 %v1227_v11 }
 0x79e   :  { %v1226_v12 = vpop.xlane.xlu1 %1225 }
 0x79f   :  { %v1230_v13 = vmul.f32 0.03125, %v1226_v12 }
 0x7a1   :  { %v1907_v18 = vsub.f32 %v1897_v8, %v1230_v13 }
 0x7a2   :  { %v1229_v19 = vpop.xlane.xlu1 %1228 }
 0x7a3   :  { %v1231_v20 = vmul.f32 0.03125, %v1229_v19  ;;  %v1234_v0 = vmul.f32 %v1907_v18, %v1907_v18 }
 0x7a5   :  { %v1912_v1 = vsub.f32 %v1900_v9, %v1231_v20  ;;  %v1236_v21 = vsel %vm29_vm0, %v1234_v0, 0.0 }
 0x7a6   :  { %1237 = vadd.xlane.f32.xlu1 %v1236_v21 }
 0x7a7   :  { %v1235_v22 = vmul.f32 %v1912_v1, %v1912_v1 }
 0x7a9   :  { %v1239_v23 = vsel %vm29_vm0, %v1235_v22, 0.0 }
 0x7aa   :  { %1240 = vadd.xlane.f32.xlu0 %v1239_v23 }
 0x82f   :  { %v1238_v38 = vpop.xlane.xlu1 %1237 }
 0x830   :  { %v1242_v39 = vmul.f32 0.03125, %v1238_v38 }
 0x832   :  { %v1244_v40 = vadd.f32 1e-05, %v1242_v39 }
 0x833   :  { %v1241_v41 = vpop.xlane.xlu0 %1240 }
 0x834   :  { %1709 = vrsqrt.f32 %v1244_v40  ;;  %v1243_v42 = vmul.f32 0.03125, %v1241_v41 }
 0x836   :  { %v1245_v43 = vadd.f32 1e-05, %v1243_v42 }
 0x838   :  { %1711 = vrsqrt.f32 %v1245_v43 }
 0x841   :  { %v1710_v46 = vpop.eup %1709 }
 0x842   :  { %v1248_v47 = vmul.f32 %v1710_v46, %v1907_v18 }
 0x844   :  { %v1254_v48 = vmul.f32 %v1253_v45, %v1248_v47 }
 0x845   :  { %v1712_v49 = vpop.eup %1711 }
 0x846   :  { %v1249_v50 = vmul.f32 %v1712_v49, %v1912_v1  ;;  %v1260_v55 = vadd.f32 %v1259_v54, %v1254_v48 }
 0x848   :  { %v1255_v51 = vmul.f32 %v1253_v45, %v1249_v50  ;;  %1628 = vmatprep.mubr.msk.f32.mxu0 %vm29_vm0, %v1260_v55 }
 0x84a   :  { %v1261_v52 = vadd.f32 %v1259_v54, %v1255_v51 }
 0x84c   :  { %1629 = vmatmul.mubr.msk.f32.vlgmr.msra.gmra.mxu0 %vm29_vm0, %v1261_v52 }
 0x90c   :  { %v1630_v62 = vpop.f32.mrf.mxu0 }
 0x90d   :  { %v1344_v63 = vadd.f32 %v1630_v62, %v1265_v61 }
 0x90e   :  { %v1338_v2 = vpop.f32.mrf.mxu0 }
 0x90f   :  { %v1339_v3 = vadd.f32 %v1338_v2, %v1265_v61  ;;  %v1348_v5 = vmax.f32 %v1344_v63, 0.0 }
 0x911   :  { %v1347_v4 = vmax.f32 %v1339_v3, 0.0 }
 0x913   :  { %1663 = vmatprep.mubr.f32.mxu1 %v1347_v4 }
 0x914   :  { %1664 = vmatmul.mubr.f32.vlgmr.msra.gmra.mxu1 %v1348_v5 }
 0x9d4   :  { %v1665_v10 = vpop.f32.mrf.mxu1 }
 0x9d5   :  { %v1441_v11 = vadd.f32 %v1665_v10, %v1368_v7 }
 0x9d6   :  { %v1435_v12 = vpop.f32.mrf.mxu1 }
 0x9d7   :  { %v1445_v13 = vadd.f32 %v1441_v11, %v1900_v9  ;;  %v1436_v18 = vadd.f32 %v1435_v12, %v1368_v7 }
 0x9d9   :  { %1447 = vst.msk [vmem:[#allocation2 + $0x8] sm:$0xff] %vm29_vm0, %v1445_v13  ;;  %v1444_v19 = vadd.f32 %v1436_v18, %v1897_v8 }
 0x9db   :  { %1446 = vst.msk [vmem:[#allocation2] sm:$0xff] %vm29_vm0, %v1444_v19 }
 0x9dc   :  { %1724 = shalt.err (!%p1721_p4)
}
 0x9dd   :  { %s1740_s15 = smov 128   ;;  %s1741_s16 = smov 8  }
 0x9de   :  { %1459 = dma.vmem_to_hbm [thread:$0]  %s1454_s13, 256, %s2001_s4, [#allocation3], %s1740_s15, %s1740_s15, %s1741_s16  }
 0x9df   :  { %1733 = dma.done.wait [#allocation3], 256  }
 0x9e0   :  { %1734 = vsyncadd [#allocation3], 4294967040 }
 0x9e1   :  { %1463 = vsyncpa [#allocation3], 1 }

</bundles_post_ra>
